<compile_context>
chip_gen: v7x
topology: tpu7x:2x2x1
jax: 0.10.0
libtpu: 0.0.40
codegen_flags: <defaults>
</compile_context>

<pallas_src>
import functools

import jax
import jax.numpy as jnp
from jax.experimental import pallas as pl
from jax.experimental.pallas import tpu as pltpu


def _damped_wave_kernel(x_ref, o_ref, *, H, W, c2, k, is_complete):
    # x_ref block: (BT, 2*H*W). Each row is [ wave (H*W) | wave_diff (H*W) ],
    # both flattened row-major on the lane axis.
    HW = H * W
    N = 2 * HW
    x = x_ref[...]                                 # (BT, N)

    # Swap halves so the wave section sits at lanes [HW, N): [ wave_diff | wave ]
    swapped = pltpu.roll(x, HW, 1)

    # 5-point stencil with pure lane rolls (roll(y, s)[p] = y[p - s]).
    up = pltpu.roll(swapped, W, 1)                 # wave[i-1, j]
    down = pltpu.roll(swapped, N - W, 1)           # wave[i+1, j]
    left = pltpu.roll(swapped, 1, 1)               # wave[i, j-1]
    right = pltpu.roll(swapped, N - 1, 1)          # wave[i, j+1]
    lap = up + down + left + right - 4.0 * swapped

    # Interior mask over the wave section (rows 1..H-2, cols 1..W-2).  Border
    # positions (where the rolls wrapped / crossed sections) are forced to 0,
    # reproducing the valid-conv + F.pad exactly.
    p = jax.lax.broadcasted_iota(jnp.int32, x.shape, 1)
    col = p % W                                    # == (p - HW) % W since HW % W == 0
    interior = (p >= HW + W) & (p < N - W) & (col > 0) & (col < W - 1)

    corrected = jnp.where(interior, c2 * lap, 0.0)
    if is_complete:
        # On lanes >= HW, x holds wave_diff at the matching spatial position.
        corrected = corrected - k * x

    # Lanes [0, HW)  -> wave_diff            (output channel 0)
    # Lanes [HW, N)  -> c^2*lap - k*wave_diff (output channel 1)
    o_ref[...] = jnp.where(p < HW, swapped, corrected).astype(o_ref.dtype)


def _choose_batch_tile(B, N, itemsize, budget_bytes):
    # ~10 live slabs of (bt, N): double-buffered in/out plus stencil temporaries.
    per_b = 10 * N * itemsize
    bt = int(max(1, min(B, budget_bytes // per_b)))
    if bt >= B:
        return B
    # A partial block's sublane dim must be a multiple of 8 for clean tiling.
    bt = (bt // 8) * 8
    while bt >= 8 and B % bt:
        bt -= 8
    if bt >= 8 and B % bt == 0:
        return bt
    # TODO(synk): no multiple-of-8 divisor of B fits the budget; fall back to the
    # whole batch per step (always correct, may exceed the soft budget for huge B*H*W).
    return B


def damped_wave_pde(state, *, c, k=0.0, is_complete=True, batch_tile=None):
    """state: (B, 2, H, W); channel 0 = wave, channel 1 = d(wave)/dt."""
    B, C, H, W = state.shape
    assert C == 2, "state must have exactly 2 channels (wave, wave_diff)"
    N = C * H * W
    itemsize = jnp.dtype(state.dtype).itemsize

    # Contiguous collapse of (2, H, W) onto the lane axis -> free relayout.
    flat = state.reshape(B, N)

    bt = batch_tile if batch_tile is not None else _choose_batch_tile(
        B, N, itemsize, 24 << 20)
    assert B % bt == 0

    working_set = 10 * bt * N * itemsize
    vmem_limit = int(min(48 << 20, max(8 << 20, working_set)))

    kernel = functools.partial(
        _damped_wave_kernel,
        H=H, W=W,
        c2=float(c) * float(c),
        k=float(k) if is_complete else 0.0,
        is_complete=is_complete,
    )
    out_flat = pl.pallas_call(
        kernel,
        out_shape=jax.ShapeDtypeStruct((B, N), state.dtype),
        grid_spec=pltpu.PrefetchScalarGridSpec(
            num_scalar_prefetch=0,
            grid=(B // bt,),
            in_specs=[pl.BlockSpec((bt, N), lambda b: (b, 0))],
            out_specs=pl.BlockSpec((bt, N), lambda b: (b, 0)),
        ),
        compiler_params=pltpu.CompilerParams(
            dimension_semantics=("parallel",),
            vmem_limit_bytes=vmem_limit,
        ),
    )(flat)
    return out_flat.reshape(B, C, H, W)


def _reference(state, c, k, is_complete):
    """Pure-JAX reference mirroring the PyTorch forward (valid conv + zero pad)."""
    wave = state[:, 0:1]
    lap_int = (
        wave[:, :, :-2, 1:-1] + wave[:, :, 2:, 1:-1]
        + wave[:, :, 1:-1, :-2] + wave[:, :, 1:-1, 2:]
        - 4.0 * wave[:, :, 1:-1, 1:-1]
    )
    lap = jnp.pad(lap_int, ((0, 0), (0, 0), (1, 1), (1, 1)))
    wave_diff = state[:, 1:2]
    corrected = c * c * lap
    if is_complete:
        corrected = corrected - k * wave_diff
    return jnp.concatenate([wave_diff, corrected], axis=1)


if __name__ == "__main__":
    # Deterministic "learned" parameters exactly as in the module:
    # c_org = 3.6 -> c = c_org * 100 ;  k_org = 45.0 -> k = k_org
    c = 3.6 * 100.0
    k = 45.0
    is_complete = True

    key = jax.random.PRNGKey(0)
    # state: (batch=2, channels=2 [wave, wave_diff], H=16, W=16)
    state = jax.random.normal(key, (2, 2, 16, 16), dtype=jnp.float32)

    out = damped_wave_pde(state, c=c, k=k, is_complete=is_complete)
    out = jax.block_until_ready(out)

    ref = _reference(state, jnp.float32(c), jnp.float32(k), is_complete)
    assert out.shape == state.shape and out.dtype == state.dtype
    assert jnp.allclose(out, ref, rtol=1e-5, atol=1e-2), "mismatch vs reference"

    print("KERNEL_OK")
</pallas_src>

<mosaic_0001>
module attributes {stable_mosaic.version = 11 : i64} {
  func.func @_damped_wave_kernel(%arg0: i32, %arg1: memref<2x512xf32, #tpu.memory_space<vmem>>, %arg2: memref<2x512xf32, #tpu.memory_space<vmem>>) attributes {dimension_semantics = [#tpu.dimension_semantics<parallel>], iteration_bounds = array<i64: 1>, scalar_prefetch = 0 : i64, scratch_operands = 0 : i64, tpu.core_type = #tpu.core_type<tc>, window_params = [{transform_indices = @transform_0, window_bounds = array<i64: 2, 512>}, {transform_indices = @transform_1, window_bounds = array<i64: 2, 512>}]} {
    %c0 = arith.constant 0 : index
    %c0_0 = arith.constant 0 : index
    %0 = vector.load %arg1[%c0, %c0_0] : memref<2x512xf32, #tpu.memory_space<vmem>>, vector<2x512xf32>
    %c256_i32 = arith.constant 256 : i32
    %1 = tpu.dynamic_rotate %0 by %c256_i32 dim 1 : vector<2x512xf32>, i32 -> vector<2x512xf32>
    %c16_i32 = arith.constant 16 : i32
    %2 = tpu.dynamic_rotate %1 by %c16_i32 dim 1 : vector<2x512xf32>, i32 -> vector<2x512xf32>
    %c496_i32 = arith.constant 496 : i32
    %3 = tpu.dynamic_rotate %1 by %c496_i32 dim 1 : vector<2x512xf32>, i32 -> vector<2x512xf32>
    %c1_i32 = arith.constant 1 : i32
    %4 = tpu.dynamic_rotate %1 by %c1_i32 dim 1 : vector<2x512xf32>, i32 -> vector<2x512xf32>
    %c511_i32 = arith.constant 511 : i32
    %5 = tpu.dynamic_rotate %1 by %c511_i32 dim 1 : vector<2x512xf32>, i32 -> vector<2x512xf32>
    %6 = arith.addf %2, %3 : vector<2x512xf32>
    %7 = arith.addf %6, %4 : vector<2x512xf32>
    %8 = arith.addf %7, %5 : vector<2x512xf32>
    %cst = arith.constant 4.000000e+00 : f32
    %9 = vector.broadcast %cst : f32 to vector<2x512xf32>
    %10 = arith.mulf %9, %1 : vector<2x512xf32>
    %11 = arith.subf %8, %10 : vector<2x512xf32>
    %12 = tpu.iota {dimensions = array<i32: 1>} : vector<2x512xi32>
    %c16_i32_1 = arith.constant 16 : i32
    %c0_i32 = arith.constant 0 : i32
    %13 = arith.cmpi eq, %c16_i32_1, %c0_i32 : i32
    %c1_i32_2 = arith.constant 1 : i32
    %14 = arith.select %13, %c1_i32_2, %c16_i32_1 : i32
    %15 = vector.broadcast %14 : i32 to vector<2x512xi32>
    %16 = arith.remsi %12, %15 : vector<2x512xi32>
    %c0_i32_3 = arith.constant 0 : i32
    %17 = vector.broadcast %c0_i32_3 : i32 to vector<2x512xi32>
    %18 = arith.cmpi ne, %16, %17 : vector<2x512xi32>
    %c0_i32_4 = arith.constant 0 : i32
    %19 = vector.broadcast %c0_i32_4 : i32 to vector<2x512xi32>
    %20 = arith.cmpi slt, %16, %19 : vector<2x512xi32>
    %c0_i32_5 = arith.constant 0 : i32
    %21 = arith.cmpi slt, %14, %c0_i32_5 : i32
    %22 = vector.broadcast %21 : i1 to vector<2x512xi1>
    %23 = vector.broadcast %22 : vector<2x512xi1> to vector<2x512xi1>
    %24 = arith.xori %20, %23 : vector<2x512xi1>
    %25 = arith.andi %24, %18 : vector<2x512xi1>
    %26 = vector.broadcast %14 : i32 to vector<2x512xi32>
    %27 = arith.addi %16, %26 : vector<2x512xi32>
    %28 = arith.select %25, %27, %16 : vector<2x512xi1>, vector<2x512xi32>
    %c272_i32 = arith.constant 272 : i32
    %29 = vector.broadcast %c272_i32 : i32 to vector<2x512xi32>
    %30 = arith.cmpi sge, %12, %29 : vector<2x512xi32>
    %c496_i32_6 = arith.constant 496 : i32
    %31 = vector.broadcast %c496_i32_6 : i32 to vector<2x512xi32>
    %32 = arith.cmpi slt, %12, %31 : vector<2x512xi32>
    %33 = arith.andi %30, %32 : vector<2x512xi1>
    %c0_i32_7 = arith.constant 0 : i32
    %34 = vector.broadcast %c0_i32_7 : i32 to vector<2x512xi32>
    %35 = arith.cmpi sgt, %28, %34 : vector<2x512xi32>
    %36 = arith.andi %33, %35 : vector<2x512xi1>
    %c15_i32 = arith.constant 15 : i32
    %37 = vector.broadcast %c15_i32 : i32 to vector<2x512xi32>
    %38 = arith.cmpi slt, %28, %37 : vector<2x512xi32>
    %39 = arith.andi %36, %38 : vector<2x512xi1>
    %cst_8 = arith.constant 1.296000e+05 : f32
    %40 = vector.broadcast %cst_8 : f32 to vector<2x512xf32>
    %41 = arith.mulf %40, %11 : vector<2x512xf32>
    %cst_9 = arith.constant 0.000000e+00 : f32
    %42 = vector.broadcast %cst_9 : f32 to vector<2x512xf32>
    %43 = arith.select %39, %41, %42 : vector<2x512xi1>, vector<2x512xf32>
    %cst_10 = arith.constant 4.500000e+01 : f32
    %44 = vector.broadcast %cst_10 : f32 to vector<2x512xf32>
    %45 = arith.mulf %44, %0 : vector<2x512xf32>
    %46 = arith.subf %43, %45 : vector<2x512xf32>
    %c256_i32_11 = arith.constant 256 : i32
    %47 = vector.broadcast %c256_i32_11 : i32 to vector<2x512xi32>
    %48 = arith.cmpi slt, %12, %47 : vector<2x512xi32>
    %49 = arith.select %48, %1, %46 : vector<2x512xi1>, vector<2x512xf32>
    %c0_12 = arith.constant 0 : index
    %c0_13 = arith.constant 0 : index
    %50 = vector.load %arg2[%c0_12, %c0_13] : memref<2x512xf32, #tpu.memory_space<vmem>>, vector<2x512xf32>
    tpu.vector_store %arg2[%c0_12, %c0_13], %49 {strides = array<i32>} : memref<2x512xf32, #tpu.memory_space<vmem>>, vector<2x512xf32>,
    return
  }
  func.func @transform_0(%arg0: i32) -> (i32, i32) {
    %c0_i32 = arith.constant 0 : i32
    %c0_i32_0 = arith.constant 0 : i32
    return %arg0, %c0_i32 : i32, i32
  }
  func.func @transform_1(%arg0: i32) -> (i32, i32) {
    %c0_i32 = arith.constant 0 : i32
    %c0_i32_0 = arith.constant 0 : i32
    return %arg0, %c0_i32 : i32, i32
  }
}

</mosaic_0001>

<bundles_post_ra>
// kernel: tpu_custom_call.1
= control target key start
LH: loop header
LB: loop body
LE: loop exit
PB: predicated region body
PF: predicated region fallthrough
CT: control target
= control target key end

     0   :  { %6 = vsyncpa [#allocation3], 0  ;;  %s411_s0 = inlined_call_operand.hbm [shape: f32[2,512], index: 0, kind: input, shape index: {}]   ;;  %s412_s1 = inlined_call_operand.hbm [shape: f32[2,512], index: 1, kind: output, shape index: {}]  }
   0x1   :  { %7 = vsyncpa [#allocation4], 0  ;;  %s334_s6 = smov [#allocation2]   ;;  %s286_s10 = scalar_lea.hbm %s411_s0, 128 }
   0x2   :  { %s14_s7 = sshll.u32 %s334_s6, 4  ;;  %p287_p0 = scmp.ne.s32.totalorder %s411_s0, %s286_s10  ;;  %s15_s7 = int_to_ptr.vmem [resolvable:$true] %s14_s7 }
   0x3   :  { %p290_p1 = scmp.lt.u32.totalorder %s286_s10, %s411_s0 }
   0x5   :  { %p292_p2 = pnand %p290_p1, %p287_p0 }
   0x7   :  { %295 = shalt.err (!%p292_p2)
}
   0x8   :  { %s296_s15 = scalar_lea.vmem %s15_s7, 128  ;;  %p301_p4 = scmp.lt.s32.totalorder %s15_s7, %s15_s7 }
   0x9   :  { %p297_p3 = scmp.ne.s32.totalorder %s15_s7, %s296_s15  ;;  %p302_p5 = scmp.lt.s32.totalorder %s296_s15, %s296_s15 }
   0xb   :  { %p303_p6 = por %p302_p5, %p301_p4 }
   0xd   :  { %p304_p7 = pnand %p303_p6, %p297_p3 }
   0xf   :  { %307 = shalt.err (!%p304_p7)
}
  0x10   :  { %17 = dma.hbm_to_vmem [thread:$0]  %s411_s0, 128, %s15_s7, [#allocation3]  }
  0x11   :  { %330 = dma.done.wait [#allocation3], 128  }
  0x12   :  { %331 = vsyncadd [#allocation3], 4294967168  ;;  %v27_v0 = vlaneseq  ;;  %v335_v1 = vmov 1983009808   ;;  %v21_v6 = vld [vmem:[#allocation2] sm:$0xff]  ;;  %s336_s18 = smov 1  }
  0x13   :  { %v25_v2 = vunpack.c.l.s4 %v335_v1  ;;  %v23_v8 = vcombine.high %v21_v6, %v21_v6  ;;  %s337_s19 = smov 16   ;;  %s338_s0 = smov 112   ;;  %v205_v25 = vmul.f32 45.0, %v21_v6 }
  0x14   :  { %v28_v3 = vshrl.u32 %v27_v0, 7  ;;  %s339_s20 = smov 127   ;;  %v53_v17 = vand.u32 127, %v27_v0  ;;  %s340_s21 = smov [#allocation5]  }
  0x15   :  { %v26_v4 = vunpack.c.0.s8 %v25_v2  ;;  %v207_v35 = vcombine.high %v205_v25, %v205_v25  ;;  %s269_s22 = sshll.u32 %s340_s21, 4  ;;  %s270_s22 = int_to_ptr.vmem [resolvable:$true] %s269_s22 }
  0x16   :  { %vm67_vm0 = vcmp.lt.s32.totalorder %v53_v17, 112  ;;  %v120_v20 = vadd.s32 384, %v53_v17  ;;  %v119_v21 = vadd.s32 256, %v53_v17  ;;  %vm54_vm1 = vcmp.lt.s32.totalorder %v53_v17, 16  ;;  %s308_s23 = scalar_lea.vmem %s270_s22, 128  ;;  %p313_p9 = scmp.lt.s32.totalorder %s270_s22, %s270_s22 }
  0x17   :  { %v363_v5 = vsub.s32 %v26_v4, %v28_v3  ;;  %vm80_vm2 = vcmp.lt.s32.totalorder %v53_v17, 1  ;;  %vm93_vm3 = vcmp.lt.s32.totalorder %v53_v17, 127  ;;  %p309_p8 = scmp.ne.s32.totalorder %s270_s22, %s308_s23  ;;  %p314_p10 = scmp.lt.s32.totalorder %s308_s23, %s308_s23 }
  0x18   :  { %v146_v26 = vand.u32 15, %v120_v20  ;;  %v139_v29 = vand.u32 15, %v119_v21  ;;  %vm176_vm4 = vcmp.lt.s32.totalorder %v120_v20, 496  ;;  %vm171_vm6 = vcmp.ge.s32.totalorder %v119_v21, 272 }
  0x19   :  { %v30_v7 = vrot.slane %v21_v6, %v363_v5  ;;  %v367_v10 = vrot.slane %v23_v8, %v363_v5  ;;  %v221_v46 = vrot.slane %v207_v35, %v363_v5  ;;  %p315_p11 = por %p314_p10, %p313_p9 }
  0x1a   :  { %vm184_vm5 = vcmp.gt.s32.totalorder %v146_v26, 0  ;;  %vm183_vm7 = vcmp.gt.s32.totalorder %v139_v29, 0  ;;  %vm383_vm9 = vcmp.lt.s32.totalorder %v146_v26, 15  ;;  %vm191_vm11 = vcmp.lt.s32.totalorder %v139_v29, 15 }
  0x1b   :  { %76 = vrot.lane.b32.xlu1 %v30_v7, %s336_s18  ;;  %48 = vrot.lane.b32.xlu0 %v30_v7, %s337_s19  ;;  %v38_v9 = vcombine.high %v30_v7, %v30_v7  ;;  %v371_v11 = vcombine.high %v367_v10, %v367_v10  ;;  %v112_v42 = vmul.f32 4.0, %v30_v7  ;;  %vm379_vm8 = vmand %vm176_vm4, %vm184_vm5  ;;  %v223_v53 = vcombine.high %v221_v46, %v221_v46  ;;  %p316_p12 = pnand %p315_p11, %p309_p8 }
  0x1c   :  { %vm187_vm10 = vmand %vm171_vm6, %vm183_vm7 }
  0x1d   :  { %v244_v12 = vcombine.low %v367_v10, %v371_v11  ;;  %v113_v40 = vmul.f32 4.0, %v38_v9  ;;  %vm196_vm12 = vmand %vm379_vm8, %vm383_vm9 }
  0x1e   :  { %vm195_vm13 = vmand %vm187_vm10, %vm191_vm11 }
  0x1f   :  { %63 = vrot.lane.b32.xlu0 %v30_v7, %s338_s0  ;;  %50 = vrot.lane.b32.xlu1 %v38_v9, %s337_s19  ;;  %v252_v61 = vrot.slane %v244_v12, %v363_v5 }
  0x23   :  { %59 = vrot.lane.b32.xlu1 %v367_v10, %s338_s0  ;;  %46 = vrot.lane.b32.xlu0 %v371_v11, %s337_s19 }
  0x27   :  { %65 = vrot.lane.b32.xlu1 %v38_v9, %s338_s0  ;;  %74 = vrot.lane.b32.xlu0 %v371_v11, %s336_s18 }
  0x2b   :  { %85 = vrot.lane.b32.xlu1 %v367_v10, %s339_s20  ;;  %78 = vrot.lane.b32.xlu0 %v38_v9, %s336_s18 }
  0x2f   :  { %91 = vrot.lane.b32.xlu1 %v38_v9, %s339_s20  ;;  %89 = vrot.lane.b32.xlu0 %v30_v7, %s339_s20 }
  0x8d   :  { %v77_v13 = vpop.permute.xlu1 %76  ;;  %v49_v14 = vpop.permute.xlu0 %48 }
  0x91   :  { %v64_v15 = vpop.permute.xlu0 %63  ;;  %v51_v16 = vpop.permute.xlu1 %50 }
  0x92   :  { %v55_v33 = vsel %vm54_vm1, %v49_v14, %v51_v16 }
  0x95   :  { %v60_v18 = vpop.permute.xlu1 %59  ;;  %v47_v19 = vpop.permute.xlu0 %46 }
  0x96   :  { %v56_v27 = vsel %vm54_vm1, %v47_v19, %v49_v14 }
  0x99   :  { %v66_v22 = vpop.permute.xlu1 %65  ;;  %v75_v23 = vpop.permute.xlu0 %74 }
  0x9a   :  { %v68_v24 = vsel %vm67_vm0, %v64_v15, %v66_v22  ;;  %v71_v28 = vsel %vm67_vm0, %v66_v22, %v60_v18  ;;  %v82_v37 = vsel %vm80_vm2, %v75_v23, %v77_v13 }
  0x9b   :  { %v100_v30 = vadd.f32 %v68_v24, %v56_v27  ;;  %v101_v36 = vadd.f32 %v71_v28, %v55_v33 }
  0x9d   :  { %v86_v31 = vpop.permute.xlu1 %85  ;;  %v79_v32 = vpop.permute.xlu0 %78  ;;  %v104_v38 = vadd.f32 %v100_v30, %v82_v37 }
  0x9e   :  { %v81_v34 = vsel %vm80_vm2, %v77_v13, %v79_v32 }
  0x9f   :  { %v105_v39 = vadd.f32 %v101_v36, %v81_v34 }
  0xa1   :  { %v92_v41 = vpop.permute.xlu1 %91  ;;  %v90_v43 = vpop.permute.xlu0 %89 }
  0xa2   :  { %v97_v47 = vsel %vm93_vm3, %v92_v41, %v86_v31  ;;  %v94_v48 = vsel %vm93_vm3, %v90_v43, %v92_v41 }
  0xa3   :  { %v109_v49 = vadd.f32 %v105_v39, %v97_v47  ;;  %v108_v50 = vadd.f32 %v104_v38, %v94_v48 }
  0xa5   :  { %v117_v51 = vsub.f32 %v109_v49, %v113_v40  ;;  %v116_v52 = vsub.f32 %v108_v50, %v112_v42 }
  0xa7   :  { %v200_v54 = vmul.f32 129600.0, %v117_v51  ;;  %v199_v55 = vmul.f32 129600.0, %v116_v52 }
  0xa9   :  { %v204_v56 = vsel %vm196_vm12, %v200_v54, 0.0  ;;  %v203_v57 = vsel %vm195_vm13, %v199_v55, 0.0 }
  0xaa   :  { %v231_v58 = vsub.f32 %v204_v56, %v223_v53  ;;  %v230_v59 = vsub.f32 %v203_v57, %v221_v46 }
  0xac   :  { %v245_v60 = vcombine.low %v230_v59, %v231_v58 }
  0xae   :  { %v259_v62 = vrot.slane %v245_v60, %v363_v5 }
  0xb0   :  { %v260_v63 = vcombine.low %v252_v61, %v259_v62 }
  0xb2   :  { %262 = vst [vmem:[#allocation5] sm:$0xff] %v260_v63 }
  0xb3   :  { %319 = shalt.err (!%p316_p12)
}
  0xb4   :  { %s320_s26 = scalar_lea.hbm %s412_s1, 128 }
  0xb5   :  { %p321_p13 = scmp.ne.s32.totalorder %s412_s1, %s320_s26  ;;  %p324_p0 = scmp.lt.u32.totalorder %s320_s26, %s412_s1 }
  0xb7   :  { %p326_p1 = pnand %p324_p0, %p321_p13 }
  0xb9   :  { %329 = shalt.err (!%p326_p1)
}
  0xba   :  { %272 = dma.vmem_to_hbm [thread:$0]  %s270_s22, 128, %s412_s1, [#allocation4]  }
  0xbb   :  { %332 = dma.done.wait [#allocation4], 128  }
  0xbc   :  { %333 = vsyncadd [#allocation4], 4294967168 }
  0xbd   :  { %276 = vsyncpa [#allocation3], 1 }
  0xbe   :  { %277 = vsyncpa [#allocation4], 1 }

</bundles_post_ra>
